<compile_context>
chip_gen: v6e
topology: v6e:2x2x1
jax: 0.10.0
libtpu: 0.0.40
codegen_flags: <defaults>
</compile_context>

<pallas_src>
import functools
import math

import jax
import jax.numpy as jnp
from jax.experimental import pallas as pl
from jax.experimental.pallas import tpu as pltpu


def make_pos_embedding(emb_size: int, maxlen: int = 5000, dtype=jnp.float32):
    """Deterministic sinusoidal table, identical to the PyTorch __init__."""
    den = jnp.exp(
        -jnp.arange(0, emb_size, 2, dtype=jnp.float32) * math.log(10000.0) / emb_size
    )
    pos = jnp.arange(0, maxlen, dtype=jnp.float32).reshape(maxlen, 1)
    pe = jnp.zeros((maxlen, emb_size), jnp.float32)
    pe = pe.at[:, 0::2].set(jnp.sin(pos * den))
    pe = pe.at[:, 1::2].set(jnp.cos(pos * den))
    return pe[:, None, :].astype(dtype)  # (maxlen, 1, emb_size) — PyTorch buffer layout


def _make_kernel(dropout_rate: float, apply_dropout: bool):
    """Kernel body: y = x + pe (pe broadcasts over batch), optional dropout."""
    # Drop iff bits < round(p * 2^32); single unsigned compare, scale folded
    # into one select/mul (minimal VALU work — matters most on v5e).
    threshold = min((1 << 32) - 1, int(round(float(dropout_rate) * float(1 << 32))))

    def kernel(*refs):
        if apply_dropout:
            x_ref, pe_ref, bits_ref, o_ref = refs
        else:
            x_ref, pe_ref, o_ref = refs
        y = x_ref[...] + pe_ref[...]          # broadcast over the batch axis
        if apply_dropout:
            keep = bits_ref[...] >= jnp.uint32(threshold)
            scale = jnp.asarray(1.0 / (1.0 - float(dropout_rate)), y.dtype)
            y = jnp.where(keep, y * scale, jnp.zeros_like(y))
        o_ref[...] = y

    return kernel


def _choose_rows(n_rows: int, row_bytes: int, sublane: int, target_bytes: int) -> int:
    """Row tile: ~target_bytes per activation block, multiple of the dtype's
    packed-sublane count, and >= 2 grid steps when possible (v7x: 2 TCs)."""
    tile = (target_bytes // max(row_bytes, 1)) // sublane * sublane
    tile = max(tile, sublane)
    if n_rows >= 2 * sublane:
        half = -(-n_rows // 2)                     # ceil(n_rows / 2)
        half = -(-half // sublane) * sublane       # round up to sublane multiple
        tile = min(tile, half)
    return int(min(tile, n_rows))


@functools.partial(jax.jit, static_argnames=("dropout_rate", "training"))
def positional_encoding(token_embedding, pos_embedding, dropout_rate: float = 0.1,
                        training: bool = False, rng_key=None):
    """Forward pass of PositionalEncoding (training=True fuses inverted dropout)."""
    S, B, E = token_embedding.shape
    maxlen = pos_embedding.shape[0]
    if S > maxlen:
        raise ValueError(f"seq_len {S} exceeds positional table maxlen {maxlen}")

    dtype = token_embedding.dtype
    itemsize = jnp.dtype(dtype).itemsize
    sublane = max(8, 32 // itemsize)          # f32: 8, bf16: 16, int8/fp8: 32
    target = 4 << 20                          # ~4 MiB activation blocks

    apply_dropout = bool(training) and float(dropout_rate) > 0.0
    kernel = _make_kernel(float(dropout_rate), apply_dropout)

    # Positional rows for this sequence, in the activation dtype.  Sliced
    # host-side so no BlockSpec ever sees a non-8-divisible partial table dim.
    pe = pos_embedding[:S].astype(dtype)      # (S, 1, E)

    if apply_dropout and rng_key is None:
        rng_key = jax.random.PRNGKey(0)

    structured = (E % 128 == 0) and (B % 8 == 0)

    if structured:
        # ---- 3-D broadcast path: minimal HBM traffic (2*SBE + SE) ----------
        row_bytes = E * itemsize
        if B > 8 and sublane * B * row_bytes > target:
            tile_b = max(8, (target // (sublane * row_bytes)) // 8 * 8)
            tile_b = min(tile_b, B)
        else:
            tile_b = B
        tile_s = _choose_rows(S, tile_b * row_bytes, sublane, target)
        grid = (pl.cdiv(S, tile_s), pl.cdiv(B, tile_b))

        x_spec = pl.BlockSpec((tile_s, tile_b, E), lambda i, j: (i, j, 0))
        pe_spec = pl.BlockSpec((tile_s, 1, E), lambda i, j: (i, 0, 0))
        in_specs = [x_spec, pe_spec]
        args = [token_embedding, pe]
        out_spec = x_spec
        out_shape = jax.ShapeDtypeStruct((S, B, E), dtype)
        if apply_dropout:
            bits = jax.random.bits(rng_key, (S, B, E), jnp.uint32)
            in_specs.append(pl.BlockSpec((tile_s, tile_b, E), lambda i, j: (i, j, 0)))
            args.append(bits)

        blk = tile_s * tile_b * E * itemsize
        pe_blk = tile_s * 8 * E * itemsize            # sublane-padded PE block
        bits_blk = tile_s * tile_b * E * 4 if apply_dropout else 0
        pe_hbm = S * E * itemsize
        semantics = ("parallel", "parallel")
        out_reshape = None
    else:
        # ---- lane-dense flat-slab fallback (small / odd widths) ------------
        total = S * B * E
        lane = None
        for cand in (2048, 1024, 512, 256, 128):
            if total % cand == 0:
                lane = cand
                break
        if lane is None:
            lane = B * E                         # odd width: correctness first
        rows = total // lane
        x_in = token_embedding.reshape(rows, lane)
        pe_full = jnp.broadcast_to(pe, (S, B, E)).reshape(rows, lane)

        tile_r = _choose_rows(rows, lane * itemsize, sublane, target)
        grid = (pl.cdiv(rows, tile_r),)
        blk_spec = pl.BlockSpec((tile_r, lane), lambda i: (i, 0))
        in_specs = [blk_spec, blk_spec]
        args = [x_in, pe_full]
        out_spec = blk_spec
        out_shape = jax.ShapeDtypeStruct((rows, lane), dtype)
        if apply_dropout:
            bits = jax.random.bits(rng_key, (rows, lane), jnp.uint32)
            in_specs.append(blk_spec)
            args.append(bits)

        blk = tile_r * lane * itemsize
        pe_blk = blk
        bits_blk = tile_r * lane * 4 if apply_dropout else 0
        pe_hbm = total * itemsize
        semantics = ("parallel",)
        out_reshape = (S, B, E)

    # Explicit VMEM budget: double-buffered x + out + pe (+ bits), with a
    # little headroom, kept under v7x's 64 MiB physical VMEM.
    need = 2 * (2 * blk + pe_blk + bits_blk)
    vmem_limit = int(min(max(need + (4 << 20), 32 << 20), 56 << 20))

    bytes_accessed = (2 * S * B * E * itemsize + pe_hbm
                      + (S * B * E * 4 if apply_dropout else 0))

    out = pl.pallas_call(
        kernel,
        out_shape=out_shape,
        grid=grid,
        in_specs=in_specs,
        out_specs=out_spec,
        compiler_params=pltpu.CompilerParams(
            dimension_semantics=semantics,
            vmem_limit_bytes=vmem_limit),
        cost_estimate=pl.CostEstimate(
            flops=S * B * E, transcendentals=0, bytes_accessed=bytes_accessed),
    )(*args)

    if out_reshape is not None:
        out = out.reshape(out_reshape)
    return out


if __name__ == "__main__":
    DROPOUT = 0.1
    key = jax.random.PRNGKey(0)
    k1, k2, kd = jax.random.split(key, 3)

    # Case 1: small, lane-odd config (E % 128 != 0) -> flat-slab fallback path.
    S1, B1, E1 = 8, 2, 32
    x1 = jax.random.normal(k1, (S1, B1, E1), dtype=jnp.float32)
    pe1 = make_pos_embedding(E1, maxlen=64, dtype=jnp.float32)
    ref1 = x1 + pe1[:S1]
    out1 = jax.block_until_ready(
        positional_encoding(x1, pe1, dropout_rate=DROPOUT, training=False))
    assert out1.shape == (S1, B1, E1)
    assert jnp.allclose(out1, ref1, atol=1e-6, rtol=1e-6)

    # Case 2: lane/sublane-aligned config -> 3-D broadcast path (multi-step grid).
    S2, B2, E2 = 24, 8, 128
    x2 = jax.random.normal(k2, (S2, B2, E2), dtype=jnp.float32)
    pe2 = make_pos_embedding(E2, maxlen=64, dtype=jnp.float32)
    ref2 = x2 + pe2[:S2]
    out2 = jax.block_until_ready(
        positional_encoding(x2, pe2, dropout_rate=DROPOUT, training=False))
    assert out2.shape == (S2, B2, E2)
    assert jnp.allclose(out2, ref2, atol=1e-6, rtol=1e-6)

    # Case 3: training mode (fused inverted dropout): every element is either
    # exactly 0 (dropped) or ref / (1 - p) (kept & rescaled).
    out3 = jax.block_until_ready(
        positional_encoding(x2, pe2, dropout_rate=DROPOUT, training=True,
                            rng_key=kd))
    scaled = ref2 / (1.0 - DROPOUT)
    ok = (out3 == 0) | (jnp.abs(out3 - scaled) <= 1e-5 + 1e-5 * jnp.abs(scaled))
    assert bool(jnp.all(ok))
    drop_frac = float(jnp.mean(out3 == 0))
    assert 0.0 < drop_frac < 0.5

    print("KERNEL_OK")
</pallas_src>

<mosaic_0001>
module attributes {stable_mosaic.version = 11 : i64} {
  func.func @kernel(%arg0: i32, %arg1: memref<1x512xf32, #tpu.memory_space<vmem>>, %arg2: memref<1x512xf32, #tpu.memory_space<vmem>>, %arg3: memref<1x512xf32, #tpu.memory_space<vmem>>) attributes {dimension_semantics = [#tpu.dimension_semantics<parallel>], iteration_bounds = array<i64: 1>, scalar_prefetch = 0 : i64, scratch_operands = 0 : i64, tpu.core_type = #tpu.core_type<tc>, window_params = [{transform_indices = @transform_0, window_bounds = array<i64: 1, 512>}, {transform_indices = @transform_1, window_bounds = array<i64: 1, 512>}, {transform_indices = @transform_2, window_bounds = array<i64: 1, 512>}]} {
    %c0 = arith.constant 0 : index
    %c0_0 = arith.constant 0 : index
    %0 = vector.load %arg1[%c0, %c0_0] : memref<1x512xf32, #tpu.memory_space<vmem>>, vector<1x512xf32>
    %c0_1 = arith.constant 0 : index
    %c0_2 = arith.constant 0 : index
    %1 = vector.load %arg2[%c0_1, %c0_2] : memref<1x512xf32, #tpu.memory_space<vmem>>, vector<1x512xf32>
    %2 = arith.addf %0, %1 : vector<1x512xf32>
    %c0_3 = arith.constant 0 : index
    %c0_4 = arith.constant 0 : index
    %3 = vector.load %arg3[%c0_3, %c0_4] : memref<1x512xf32, #tpu.memory_space<vmem>>, vector<1x512xf32>
    tpu.vector_store %arg3[%c0_3, %c0_4], %2 {strides = array<i32>} : memref<1x512xf32, #tpu.memory_space<vmem>>, vector<1x512xf32>,
    return
  }
  func.func @transform_0(%arg0: i32) -> (i32, i32) {
    %c0_i32 = arith.constant 0 : i32
    %c0_i32_0 = arith.constant 0 : i32
    return %arg0, %c0_i32 : i32, i32
  }
  func.func @transform_1(%arg0: i32) -> (i32, i32) {
    %c0_i32 = arith.constant 0 : i32
    %c0_i32_0 = arith.constant 0 : i32
    return %arg0, %c0_i32 : i32, i32
  }
  func.func @transform_2(%arg0: i32) -> (i32, i32) {
    %c0_i32 = arith.constant 0 : i32
    %c0_i32_0 = arith.constant 0 : i32
    return %arg0, %c0_i32 : i32, i32
  }
}

</mosaic_0001>

<bundles_post_ra>
// kernel: positional_encoding.1
= control target key start
LH: loop header
LB: loop body
LE: loop exit
PB: predicated region body
PF: predicated region fallthrough
CT: control target
= control target key end

     0   :  { %v14_v0 = vlaneseq  ;;  %s47_s0 = inlined_call_operand.vmem [shape: f32[1,512], index: 0, kind: input, shape index: {}]   ;;  %s48_s1 = inlined_call_operand.vmem [shape: f32[1,512], index: 1, kind: input, shape index: {}]   ;;  %s49_s2 = inlined_call_operand.vmem [shape: f32[1,512], index: 2, kind: output, shape index: {}]  }
   0x1   :  { %v11_v1 = vld [vmem:[%s47_s0] sm:$0xf] }
   0x2   :  { %v12_v2 = vld [vmem:[%s48_s1] sm:$0xf]  ;;  %vm16_vm0 = vcmp.lt.s32.totalorder %v14_v0, 512 }
   0x3   :  { %v13_v3 = vadd.f32 %v12_v2, %v11_v1 }
   0x5   :  { %18 = vst.msk [vmem:[%s49_s2] sm:$0xf] %vm16_vm0, %v13_v3 }

</bundles_post_ra>
